<compile_context>
chip_gen: v6e
topology: v6e:2x2x1
jax: 0.10.0
libtpu: 0.0.40
codegen_flags: <defaults>
</compile_context>

<pallas_src>
import math
from functools import partial

import jax
import jax.numpy as jnp
from jax.experimental import pallas as pl
from jax.experimental.pallas import tpu as pltpu


# --------------------------------------------------------------------------- #
# Kernel
# --------------------------------------------------------------------------- #
def attention_kernel(boundary_ref,                       # scalar prefetch (SMEM), (B,)
                     x_ref,                              # (1, T, C) bf16
                     wqkv_ref, bqkv_ref,                 # (C, 3C) bf16, (1, 3C) f32
                     wp_ref, bp_ref,                     # (C, C)  bf16, (1, C)  f32
                     o_ref,                              # (1, q_tile, C) f32
                     y_sc,                               # VMEM scratch (q_tile, C) f32
                     *, n_head, len_key_states, q_tile, use_cot_mask):
    b = pl.program_id(0)        # batch element
    qi = pl.program_id(1)       # query tile

    x = x_ref[0]                # (T, C) bf16 : full sequence, used for K / V
    T, C = x.shape
    D = C // n_head
    scale = 1.0 / math.sqrt(D)

    # ---- fused q/k/v projection: bf16 MXU matmul, f32 accumulate -------------
    if q_tile == T:             # single query tile (default / toy config)
        qkv = (jnp.dot(x, wqkv_ref[...], preferred_element_type=jnp.float32)
               + bqkv_ref[...])                                    # (T, 3C) f32
        q_f = qkv[:, :C]
        k_f = qkv[:, C:2 * C]
        v_f = qkv[:, 2 * C:]
    else:                       # tiled queries: q for this tile only, kv full
        start = pl.multiple_of(qi * q_tile, q_tile)
        x_q = x_ref[0, pl.ds(start, q_tile), :]
        q_f = (jnp.dot(x_q, wqkv_ref[:, :C], preferred_element_type=jnp.float32)
               + bqkv_ref[:, :C])
        kv = (jnp.dot(x, wqkv_ref[:, C:], preferred_element_type=jnp.float32)
              + bqkv_ref[:, C:])
        k_f = kv[:, :C]
        v_f = kv[:, C:]

    q = (q_f * scale).astype(jnp.bfloat16)    # fold 1/sqrt(D) into q once
    kt = k_f.T.astype(jnp.bfloat16)           # (C, T): transpose once, not per head
    v = v_f.astype(jnp.bfloat16)

    # ---- additive attention bias, built once from the scalar boundary -------
    rows = jax.lax.broadcasted_iota(jnp.int32, (q_tile, T), 0) + qi * q_tile
    cols = jax.lax.broadcasted_iota(jnp.int32, (q_tile, T), 1)
    # causal mask with the first len_key_states query rows fully open
    causal_open = (cols <= rows) | (rows < len_key_states)
    masked = jnp.logical_not(causal_open)
    if use_cot_mask:
        bound = boundary_ref[b]              # r + len_key_states (SMEM scalar)
        masked = masked | ((rows < len_key_states) & (cols > bound))
    bias = jnp.where(masked, jnp.float32(-1e30), jnp.float32(0.0))

    # ---- per-head attention; head outputs land in the VMEM slab -------------
    # TODO(synk): for large n_head switch to a fori_loop over heads to bound
    #             the number of live (q_tile, T) score tensors.
    for h in range(n_head):
        sl = slice(h * D, (h + 1) * D)
        s = jnp.dot(q[:, sl], kt[sl, :],
                    preferred_element_type=jnp.float32) + bias        # (q_tile, T)
        m = jnp.max(s, axis=-1, keepdims=True)
        e = jnp.exp(s - m)                                            # f32 EUP
        p = e * pl.reciprocal(jnp.sum(e, axis=-1, keepdims=True), approx=True)
        y_sc[:, sl] = jnp.dot(p.astype(jnp.bfloat16), v[:, sl],
                              preferred_element_type=jnp.float32)

    # ---- output projection (single MXU-friendly (q_tile,C)x(C,C) matmul) ----
    y = jnp.dot(y_sc[...].astype(jnp.bfloat16), wp_ref[...],
                preferred_element_type=jnp.float32) + bp_ref[...]
    o_ref[0] = y.astype(o_ref.dtype)


# --------------------------------------------------------------------------- #
# Wrapper
# --------------------------------------------------------------------------- #
@partial(jax.jit, static_argnames=("n_head", "len_key_states", "q_tile",
                                   "use_cot_mask", "vmem_limit_bytes"))
def causal_self_attention_with_cot(x, key_state_boundary, params, *,
                                   n_head, len_key_states, q_tile=None,
                                   use_cot_mask=True, vmem_limit_bytes=None):
    """Forward of CausalSelfAttentionWithCoT (dropouts = identity / eval).

    x:                   (B, T, C) float32
    key_state_boundary:  (B,) int32, = r + len_key_states; for the key-state
                         query rows, columns > boundary are masked (CoT mask).
    params:              dict of (in, out)-layout weights + (1, C) biases.
    """
    B, T, C = x.shape
    assert C % n_head == 0
    if q_tile is None or q_tile >= T:
        q_tile = T
    elif (T % q_tile) or (q_tile % 8):
        raise ValueError("q_tile must divide T and be a multiple of 8")
    nq = T // q_tile

    x_bf = x.astype(jnp.bfloat16)
    # Fuse the three projection weights -> one (C, 3C) matmul in-kernel.
    # TODO(synk): in a real model store the fused weight to avoid per-call concat.
    w_qkv = jnp.concatenate([params["wq"], params["wk"], params["wv"]],
                            axis=1).astype(jnp.bfloat16)             # (C, 3C)
    b_qkv = jnp.concatenate([params["bq"], params["bk"], params["bv"]],
                            axis=1).astype(jnp.float32)              # (1, 3C)
    wp = params["wp"].astype(jnp.bfloat16)
    bp = params["bp"].astype(jnp.float32)
    ops = [w_qkv, b_qkv, wp, bp]

    const_map = lambda b, qi, bnd: (0, 0)
    in_specs = [pl.BlockSpec((1, T, C), lambda b, qi, bnd: (b, 0, 0))]
    in_specs += [pl.BlockSpec(op.shape, const_map) for op in ops]

    kernel = partial(attention_kernel, n_head=n_head,
                     len_key_states=len_key_states, q_tile=q_tile,
                     use_cot_mask=use_cot_mask)

    return pl.pallas_call(
        kernel,
        out_shape=jax.ShapeDtypeStruct((B, T, C), jnp.float32),
        grid_spec=pltpu.PrefetchScalarGridSpec(
            num_scalar_prefetch=1,
            grid=(B, nq),
            in_specs=in_specs,
            out_specs=pl.BlockSpec((1, q_tile, C), lambda b, qi, bnd: (b, qi, 0)),
            scratch_shapes=[pltpu.VMEM((q_tile, C), jnp.float32)],
        ),
        compiler_params=pltpu.CompilerParams(
            dimension_semantics=("parallel", "parallel"),
            vmem_limit_bytes=vmem_limit_bytes,
        ),
    )(key_state_boundary.astype(jnp.int32), x_bf, *ops)


# --------------------------------------------------------------------------- #
# Pure-JAX reference (mirrors the PyTorch forward, f32, eval mode)
# --------------------------------------------------------------------------- #
def reference_forward(x, key_state_boundary, params, n_head, len_key_states):
    B, T, C = x.shape
    D = C // n_head
    lin = lambda a, w, b: a @ w + b
    q = lin(x, params["wq"], params["bq"]).reshape(B, T, n_head, D).transpose(0, 2, 1, 3)
    k = lin(x, params["wk"], params["bk"]).reshape(B, T, n_head, D).transpose(0, 2, 1, 3)
    v = lin(x, params["wv"], params["bv"]).reshape(B, T, n_head, D).transpose(0, 2, 1, 3)
    att = (q @ jnp.swapaxes(k, -1, -2)) * (1.0 / math.sqrt(D))
    rows = jnp.arange(T)[:, None]
    cols = jnp.arange(T)[None, :]
    causal_open = (cols <= rows) | (rows < len_key_states)          # (T, T)
    att = jnp.where(causal_open[None, None], att, -jnp.inf)
    ksm = (rows[None] < len_key_states) & (cols[None] > key_state_boundary[:, None, None])
    att = jnp.where(ksm[:, None], -jnp.inf, att)
    att = jax.nn.softmax(att, axis=-1)
    y = (att @ v).transpose(0, 2, 1, 3).reshape(B, T, C)
    return y @ params["wp"] + params["bp"]


def init_params(key, n_embd):
    C = n_embd
    ks = jax.random.split(key, 8)
    w = lambda k, shape: jax.random.normal(k, shape, jnp.float32) * 0.02
    return {
        "wq": w(ks[0], (C, C)), "bq": w(ks[1], (1, C)),
        "wk": w(ks[2], (C, C)), "bk": w(ks[3], (1, C)),
        "wv": w(ks[4], (C, C)), "bv": w(ks[5], (1, C)),
        "wp": w(ks[6], (C, C)), "bp": w(ks[7], (1, C)),
    }


# --------------------------------------------------------------------------- #
# Demo / self-test
# --------------------------------------------------------------------------- #
if __name__ == "__main__":
    # config: n_embd=32, n_head=4, len_key_states=2, block_size=8
    #         -> T = block_size + len_key_states = 10, model_type='cot'
    B, T, C, H, LKS = 2, 10, 32, 4, 2

    key = jax.random.PRNGKey(0)
    kx, kr, kp = jax.random.split(key, 3)
    x = jax.random.normal(kx, (B, T, C), jnp.float32)
    # BlocksWithCoT draws r in [0, T - len_key_states); the CoT key_state_mask
    # masks columns > r + len_key_states for the key-state query rows.
    r = jax.random.randint(kr, (B,), 0, T - LKS)
    key_state_boundary = (r + LKS).astype(jnp.int32)
    params = init_params(kp, C)

    y = causal_self_attention_with_cot(x, key_state_boundary, params,
                                       n_head=H, len_key_states=LKS)
    jax.block_until_ready(y)
    assert y.shape == (B, T, C)

    y_ref = reference_forward(x, key_state_boundary, params, H, LKS)
    err = float(jnp.max(jnp.abs(y - y_ref)))
    assert err < 5e-2, f"mismatch vs reference: max|err|={err}"
    print("KERNEL_OK")
</pallas_src>

<mosaic_0001>
module attributes {stable_mosaic.version = 11 : i64} {
  func.func @attention_kernel(%arg0: i32, %arg1: i32, %arg2: memref<2xi32, #tpu.memory_space<smem>>, %arg3: memref<1x10x32xbf16, #tpu.memory_space<vmem>>, %arg4: memref<32x96xbf16, #tpu.memory_space<vmem>>, %arg5: memref<1x96xf32, #tpu.memory_space<vmem>>, %arg6: memref<32x32xbf16, #tpu.memory_space<vmem>>, %arg7: memref<1x32xf32, #tpu.memory_space<vmem>>, %arg8: memref<1x10x32xf32, #tpu.memory_space<vmem>>, %arg9: memref<10x32xf32, #tpu.memory_space<vmem>>) attributes {dimension_semantics = [#tpu.dimension_semantics<parallel>, #tpu.dimension_semantics<parallel>], iteration_bounds = array<i64: 2, 1>, scalar_prefetch = 1 : i64, scratch_operands = 1 : i64, tpu.core_type = #tpu.core_type<tc>, window_params = [{transform_indices = @transform_0, window_bounds = array<i64: 1, 10, 32>}, {pipeline_mode = #tpu.pipeline_mode<synchronous>, transform_indices = @transform_1, window_bounds = array<i64: 32, 96>}, {pipeline_mode = #tpu.pipeline_mode<synchronous>, transform_indices = @transform_2, window_bounds = array<i64: 1, 96>}, {pipeline_mode = #tpu.pipeline_mode<synchronous>, transform_indices = @transform_3, window_bounds = array<i64: 32, 32>}, {pipeline_mode = #tpu.pipeline_mode<synchronous>, transform_indices = @transform_4, window_bounds = array<i64: 1, 32>}, {transform_indices = @transform_5, window_bounds = array<i64: 1, 10, 32>}]} {
    %c0 = arith.constant 0 : index
    %c0_0 = arith.constant 0 : index
    %c0_1 = arith.constant 0 : index
    %0 = vector.load %arg3[%c0, %c0_0, %c0_1] : memref<1x10x32xbf16, #tpu.memory_space<vmem>>, vector<1x10x32xbf16>
    %1 = vector.shape_cast %0 : vector<1x10x32xbf16> to vector<10x32xbf16>
    %c0_2 = arith.constant 0 : index
    %c0_3 = arith.constant 0 : index
    %2 = vector.load %arg4[%c0_2, %c0_3] : memref<32x96xbf16, #tpu.memory_space<vmem>>, vector<32x96xbf16>
    %cst = arith.constant dense<0.000000e+00> : vector<10x96xf32>
    %3 = tpu.matmul %1, %2, %cst {dimension_numbers = #tpu.dot_dimension_numbers<[1], [0], [0], [1], [0, 0, 1, 1], [], []>} : vector<10x32xbf16>, vector<32x96xbf16>, vector<10x96xf32> -> vector<10x96xf32>
    %c0_4 = arith.constant 0 : index
    %c0_5 = arith.constant 0 : index
    %4 = vector.load %arg5[%c0_4, %c0_5] : memref<1x96xf32, #tpu.memory_space<vmem>>, vector<1x96xf32>
    %5 = vector.broadcast %4 : vector<1x96xf32> to vector<10x96xf32>
    %6 = arith.addf %3, %5 : vector<10x96xf32>
    %7 = vector.extract_strided_slice %6 {offsets = [0, 0], sizes = [10, 32], strides = [1, 1]} : vector<10x96xf32> to vector<10x32xf32>
    %8 = vector.extract_strided_slice %6 {offsets = [0, 32], sizes = [10, 32], strides = [1, 1]} : vector<10x96xf32> to vector<10x32xf32>
    %9 = vector.extract_strided_slice %6 {offsets = [0, 64], sizes = [10, 32], strides = [1, 1]} : vector<10x96xf32> to vector<10x32xf32>
    %cst_6 = arith.constant 0.353553385 : f32
    %10 = vector.broadcast %cst_6 : f32 to vector<10x32xf32>
    %11 = arith.mulf %7, %10 : vector<10x32xf32>
    %12 = arith.truncf %11 : vector<10x32xf32> to vector<10x32xbf16>
    %13 = tpu.transpose %8, [1, 0] : vector<10x32xf32> -> vector<32x10xf32>
    %14 = arith.truncf %13 : vector<32x10xf32> to vector<32x10xbf16>
    %15 = arith.truncf %9 : vector<10x32xf32> to vector<10x32xbf16>
    %16 = tpu.iota {dimensions = array<i32: 0>} : vector<10x10xi32>
    %c10_i32 = arith.constant 10 : i32
    %17 = arith.muli %arg1, %c10_i32 : i32
    %18 = vector.broadcast %17 : i32 to vector<10x10xi32>
    %19 = arith.addi %16, %18 : vector<10x10xi32>
    %20 = tpu.iota {dimensions = array<i32: 1>} : vector<10x10xi32>
    %21 = arith.cmpi sle, %20, %19 : vector<10x10xi32>
    %c2_i32 = arith.constant 2 : i32
    %22 = vector.broadcast %c2_i32 : i32 to vector<10x10xi32>
    %23 = arith.cmpi slt, %19, %22 : vector<10x10xi32>
    %24 = arith.ori %21, %23 : vector<10x10xi1>
    %cst_7 = arith.constant dense<true> : vector<10x10xi1>
    %25 = arith.xori %24, %cst_7 : vector<10x10xi1>
    %26 = arith.index_cast %arg0 : i32 to index
    %27 = memref.load %arg2[%26] : memref<2xi32, #tpu.memory_space<smem>>
    %c2_i32_8 = arith.constant 2 : i32
    %28 = vector.broadcast %c2_i32_8 : i32 to vector<10x10xi32>
    %29 = arith.cmpi slt, %19, %28 : vector<10x10xi32>
    %30 = vector.broadcast %27 : i32 to vector<10x10xi32>
    %31 = arith.cmpi sgt, %20, %30 : vector<10x10xi32>
    %32 = arith.andi %29, %31 : vector<10x10xi1>
    %33 = arith.ori %25, %32 : vector<10x10xi1>
    %cst_9 = arith.constant -1.000000e+30 : f32
    %cst_10 = arith.constant 0.000000e+00 : f32
    %34 = vector.broadcast %cst_9 : f32 to vector<10x10xf32>
    %35 = vector.broadcast %cst_10 : f32 to vector<10x10xf32>
    %36 = arith.select %33, %34, %35 : vector<10x10xi1>, vector<10x10xf32>
    %37 = vector.extract_strided_slice %12 {offsets = [0, 0], sizes = [10, 8], strides = [1, 1]} : vector<10x32xbf16> to vector<10x8xbf16>
    %38 = vector.extract_strided_slice %14 {offsets = [0, 0], sizes = [8, 10], strides = [1, 1]} : vector<32x10xbf16> to vector<8x10xbf16>
    %cst_11 = arith.constant dense<0.000000e+00> : vector<10x10xf32>
    %39 = tpu.matmul %37, %38, %cst_11 {dimension_numbers = #tpu.dot_dimension_numbers<[1], [0], [0], [1], [0, 0, 1, 1], [], []>} : vector<10x8xbf16>, vector<8x10xbf16>, vector<10x10xf32> -> vector<10x10xf32>
    %40 = arith.addf %39, %36 : vector<10x10xf32>
    %cst_12 = arith.constant dense<0xFF800000> : vector<10xf32>
    %41 = vector.multi_reduction <maximumf>, %40, %cst_12 [1] : vector<10x10xf32> to vector<10xf32>
    %42 = vector.shape_cast %41 : vector<10xf32> to vector<10x1xf32>
    %43 = vector.broadcast %42 : vector<10x1xf32> to vector<10x10xf32>
    %44 = arith.subf %40, %43 : vector<10x10xf32>
    %45 = math.exp %44 : vector<10x10xf32>
    %cst_13 = arith.constant dense<0.000000e+00> : vector<10xf32>
    %46 = vector.multi_reduction <add>, %45, %cst_13 [1] : vector<10x10xf32> to vector<10xf32>
    %47 = vector.shape_cast %46 : vector<10xf32> to vector<10x1xf32>
    %48 = tpu.reciprocal %47 {approx = true} : vector<10x1xf32> -> vector<10x1xf32>
    %49 = vector.broadcast %48 : vector<10x1xf32> to vector<10x10xf32>
    %50 = arith.mulf %45, %49 : vector<10x10xf32>
    %51 = arith.truncf %50 : vector<10x10xf32> to vector<10x10xbf16>
    %52 = vector.extract_strided_slice %15 {offsets = [0, 0], sizes = [10, 8], strides = [1, 1]} : vector<10x32xbf16> to vector<10x8xbf16>
    %cst_14 = arith.constant dense<0.000000e+00> : vector<10x8xf32>
    %53 = tpu.matmul %51, %52, %cst_14 {dimension_numbers = #tpu.dot_dimension_numbers<[1], [0], [0], [1], [0, 0, 1, 1], [], []>} : vector<10x10xbf16>, vector<10x8xbf16>, vector<10x8xf32> -> vector<10x8xf32>
    %c0_15 = arith.constant 0 : index
    %c0_16 = arith.constant 0 : index
    %54 = vector.load %arg9[%c0_15, %c0_16] : memref<10x32xf32, #tpu.memory_space<vmem>>, vector<10x8xf32>
    tpu.vector_store %arg9[%c0_15, %c0_16], %53 {strides = array<i32>} : memref<10x32xf32, #tpu.memory_space<vmem>>, vector<10x8xf32>,
    %55 = vector.extract_strided_slice %12 {offsets = [0, 8], sizes = [10, 8], strides = [1, 1]} : vector<10x32xbf16> to vector<10x8xbf16>
    %56 = vector.extract_strided_slice %14 {offsets = [8, 0], sizes = [8, 10], strides = [1, 1]} : vector<32x10xbf16> to vector<8x10xbf16>
    %cst_17 = arith.constant dense<0.000000e+00> : vector<10x10xf32>
    %57 = tpu.matmul %55, %56, %cst_17 {dimension_numbers = #tpu.dot_dimension_numbers<[1], [0], [0], [1], [0, 0, 1, 1], [], []>} : vector<10x8xbf16>, vector<8x10xbf16>, vector<10x10xf32> -> vector<10x10xf32>
    %58 = arith.addf %57, %36 : vector<10x10xf32>
    %cst_18 = arith.constant dense<0xFF800000> : vector<10xf32>
    %59 = vector.multi_reduction <maximumf>, %58, %cst_18 [1] : vector<10x10xf32> to vector<10xf32>
    %60 = vector.shape_cast %59 : vector<10xf32> to vector<10x1xf32>
    %61 = vector.broadcast %60 : vector<10x1xf32> to vector<10x10xf32>
    %62 = arith.subf %58, %61 : vector<10x10xf32>
    %63 = math.exp %62 : vector<10x10xf32>
    %cst_19 = arith.constant dense<0.000000e+00> : vector<10xf32>
    %64 = vector.multi_reduction <add>, %63, %cst_19 [1] : vector<10x10xf32> to vector<10xf32>
    %65 = vector.shape_cast %64 : vector<10xf32> to vector<10x1xf32>
    %66 = tpu.reciprocal %65 {approx = true} : vector<10x1xf32> -> vector<10x1xf32>
    %67 = vector.broadcast %66 : vector<10x1xf32> to vector<10x10xf32>
    %68 = arith.mulf %63, %67 : vector<10x10xf32>
    %69 = arith.truncf %68 : vector<10x10xf32> to vector<10x10xbf16>
    %70 = vector.extract_strided_slice %15 {offsets = [0, 8], sizes = [10, 8], strides = [1, 1]} : vector<10x32xbf16> to vector<10x8xbf16>
    %cst_20 = arith.constant dense<0.000000e+00> : vector<10x8xf32>
    %71 = tpu.matmul %69, %70, %cst_20 {dimension_numbers = #tpu.dot_dimension_numbers<[1], [0], [0], [1], [0, 0, 1, 1], [], []>} : vector<10x10xbf16>, vector<10x8xbf16>, vector<10x8xf32> -> vector<10x8xf32>
    %c0_21 = arith.constant 0 : index
    %c8 = arith.constant 8 : index
    %72 = vector.load %arg9[%c0_21, %c8] : memref<10x32xf32, #tpu.memory_space<vmem>>, vector<10x8xf32>
    tpu.vector_store %arg9[%c0_21, %c8], %71 {strides = array<i32>} : memref<10x32xf32, #tpu.memory_space<vmem>>, vector<10x8xf32>,
    %73 = vector.extract_strided_slice %12 {offsets = [0, 16], sizes = [10, 8], strides = [1, 1]} : vector<10x32xbf16> to vector<10x8xbf16>
    %74 = vector.extract_strided_slice %14 {offsets = [16, 0], sizes = [8, 10], strides = [1, 1]} : vector<32x10xbf16> to vector<8x10xbf16>
    %cst_22 = arith.constant dense<0.000000e+00> : vector<10x10xf32>
    %75 = tpu.matmul %73, %74, %cst_22 {dimension_numbers = #tpu.dot_dimension_numbers<[1], [0], [0], [1], [0, 0, 1, 1], [], []>} : vector<10x8xbf16>, vector<8x10xbf16>, vector<10x10xf32> -> vector<10x10xf32>
    %76 = arith.addf %75, %36 : vector<10x10xf32>
    %cst_23 = arith.constant dense<0xFF800000> : vector<10xf32>
    %77 = vector.multi_reduction <maximumf>, %76, %cst_23 [1] : vector<10x10xf32> to vector<10xf32>
    %78 = vector.shape_cast %77 : vector<10xf32> to vector<10x1xf32>
    %79 = vector.broadcast %78 : vector<10x1xf32> to vector<10x10xf32>
    %80 = arith.subf %76, %79 : vector<10x10xf32>
    %81 = math.exp %80 : vector<10x10xf32>
    %cst_24 = arith.constant dense<0.000000e+00> : vector<10xf32>
    %82 = vector.multi_reduction <add>, %81, %cst_24 [1] : vector<10x10xf32> to vector<10xf32>
    %83 = vector.shape_cast %82 : vector<10xf32> to vector<10x1xf32>
    %84 = tpu.reciprocal %83 {approx = true} : vector<10x1xf32> -> vector<10x1xf32>
    %85 = vector.broadcast %84 : vector<10x1xf32> to vector<10x10xf32>
    %86 = arith.mulf %81, %85 : vector<10x10xf32>
    %87 = arith.truncf %86 : vector<10x10xf32> to vector<10x10xbf16>
    %88 = vector.extract_strided_slice %15 {offsets = [0, 16], sizes = [10, 8], strides = [1, 1]} : vector<10x32xbf16> to vector<10x8xbf16>
    %cst_25 = arith.constant dense<0.000000e+00> : vector<10x8xf32>
    %89 = tpu.matmul %87, %88, %cst_25 {dimension_numbers = #tpu.dot_dimension_numbers<[1], [0], [0], [1], [0, 0, 1, 1], [], []>} : vector<10x10xbf16>, vector<10x8xbf16>, vector<10x8xf32> -> vector<10x8xf32>
    %c0_26 = arith.constant 0 : index
    %c16 = arith.constant 16 : index
    %90 = vector.load %arg9[%c0_26, %c16] : memref<10x32xf32, #tpu.memory_space<vmem>>, vector<10x8xf32>
    tpu.vector_store %arg9[%c0_26, %c16], %89 {strides = array<i32>} : memref<10x32xf32, #tpu.memory_space<vmem>>, vector<10x8xf32>,
    %91 = vector.extract_strided_slice %12 {offsets = [0, 24], sizes = [10, 8], strides = [1, 1]} : vector<10x32xbf16> to vector<10x8xbf16>
    %92 = vector.extract_strided_slice %14 {offsets = [24, 0], sizes = [8, 10], strides = [1, 1]} : vector<32x10xbf16> to vector<8x10xbf16>
    %cst_27 = arith.constant dense<0.000000e+00> : vector<10x10xf32>
    %93 = tpu.matmul %91, %92, %cst_27 {dimension_numbers = #tpu.dot_dimension_numbers<[1], [0], [0], [1], [0, 0, 1, 1], [], []>} : vector<10x8xbf16>, vector<8x10xbf16>, vector<10x10xf32> -> vector<10x10xf32>
    %94 = arith.addf %93, %36 : vector<10x10xf32>
    %cst_28 = arith.constant dense<0xFF800000> : vector<10xf32>
    %95 = vector.multi_reduction <maximumf>, %94, %cst_28 [1] : vector<10x10xf32> to vector<10xf32>
    %96 = vector.shape_cast %95 : vector<10xf32> to vector<10x1xf32>
    %97 = vector.broadcast %96 : vector<10x1xf32> to vector<10x10xf32>
    %98 = arith.subf %94, %97 : vector<10x10xf32>
    %99 = math.exp %98 : vector<10x10xf32>
    %cst_29 = arith.constant dense<0.000000e+00> : vector<10xf32>
    %100 = vector.multi_reduction <add>, %99, %cst_29 [1] : vector<10x10xf32> to vector<10xf32>
    %101 = vector.shape_cast %100 : vector<10xf32> to vector<10x1xf32>
    %102 = tpu.reciprocal %101 {approx = true} : vector<10x1xf32> -> vector<10x1xf32>
    %103 = vector.broadcast %102 : vector<10x1xf32> to vector<10x10xf32>
    %104 = arith.mulf %99, %103 : vector<10x10xf32>
    %105 = arith.truncf %104 : vector<10x10xf32> to vector<10x10xbf16>
    %106 = vector.extract_strided_slice %15 {offsets = [0, 24], sizes = [10, 8], strides = [1, 1]} : vector<10x32xbf16> to vector<10x8xbf16>
    %cst_30 = arith.constant dense<0.000000e+00> : vector<10x8xf32>
    %107 = tpu.matmul %105, %106, %cst_30 {dimension_numbers = #tpu.dot_dimension_numbers<[1], [0], [0], [1], [0, 0, 1, 1], [], []>} : vector<10x10xbf16>, vector<10x8xbf16>, vector<10x8xf32> -> vector<10x8xf32>
    %c0_31 = arith.constant 0 : index
    %c24 = arith.constant 24 : index
    %108 = vector.load %arg9[%c0_31, %c24] : memref<10x32xf32, #tpu.memory_space<vmem>>, vector<10x8xf32>
    tpu.vector_store %arg9[%c0_31, %c24], %107 {strides = array<i32>} : memref<10x32xf32, #tpu.memory_space<vmem>>, vector<10x8xf32>,
    %c0_32 = arith.constant 0 : index
    %c0_33 = arith.constant 0 : index
    %109 = vector.load %arg9[%c0_32, %c0_33] : memref<10x32xf32, #tpu.memory_space<vmem>>, vector<10x32xf32>
    %110 = arith.truncf %109 : vector<10x32xf32> to vector<10x32xbf16>
    %c0_34 = arith.constant 0 : index
    %c0_35 = arith.constant 0 : index
    %111 = vector.load %arg6[%c0_34, %c0_35] : memref<32x32xbf16, #tpu.memory_space<vmem>>, vector<32x32xbf16>
    %cst_36 = arith.constant dense<0.000000e+00> : vector<10x32xf32>
    %112 = tpu.matmul %110, %111, %cst_36 {dimension_numbers = #tpu.dot_dimension_numbers<[1], [0], [0], [1], [0, 0, 1, 1], [], []>} : vector<10x32xbf16>, vector<32x32xbf16>, vector<10x32xf32> -> vector<10x32xf32>
    %c0_37 = arith.constant 0 : index
    %c0_38 = arith.constant 0 : index
    %113 = vector.load %arg7[%c0_37, %c0_38] : memref<1x32xf32, #tpu.memory_space<vmem>>, vector<1x32xf32>
    %114 = vector.broadcast %113 : vector<1x32xf32> to vector<10x32xf32>
    %115 = arith.addf %112, %114 : vector<10x32xf32>
    %c0_39 = arith.constant 0 : index
    %c0_40 = arith.constant 0 : index
    %c0_41 = arith.constant 0 : index
    %116 = vector.load %arg8[%c0_39, %c0_40, %c0_41] : memref<1x10x32xf32, #tpu.memory_space<vmem>>, vector<1x10x32xf32>
    %117 = vector.shape_cast %116 : vector<1x10x32xf32> to vector<10x32xf32>
    %118 = vector.shape_cast %115 : vector<10x32xf32> to vector<1x10x32xf32>
    tpu.vector_store %arg8[%c0_39, %c0_40, %c0_41], %118 {strides = array<i32>} : memref<1x10x32xf32, #tpu.memory_space<vmem>>, vector<1x10x32xf32>,
    return
  }
  func.func @transform_0(%arg0: i32, %arg1: i32, %arg2: memref<2xi32, #tpu.memory_space<smem>>) -> (i32, i32, i32) {
    %c0_i32 = arith.constant 0 : i32
    %c0_i32_0 = arith.constant 0 : i32
    %c0_i32_1 = arith.constant 0 : i32
    return %arg0, %c0_i32, %c0_i32_0 : i32, i32, i32
  }
  func.func @transform_1(%arg0: i32, %arg1: i32, %arg2: memref<2xi32, #tpu.memory_space<smem>>) -> (i32, i32) {
    %c0_i32 = arith.constant 0 : i32
    %c0_i32_0 = arith.constant 0 : i32
    %c0_i32_1 = arith.constant 0 : i32
    return %c0_i32, %c0_i32_0 : i32, i32
  }
  func.func @transform_2(%arg0: i32, %arg1: i32, %arg2: memref<2xi32, #tpu.memory_space<smem>>) -> (i32, i32) {
    %c0_i32 = arith.constant 0 : i32
    %c0_i32_0 = arith.constant 0 : i32
    %c0_i32_1 = arith.constant 0 : i32
    return %c0_i32, %c0_i32_0 : i32, i32
  }
  func.func @transform_3(%arg0: i32, %arg1: i32, %arg2: memref<2xi32, #tpu.memory_space<smem>>) -> (i32, i32) {
    %c0_i32 = arith.constant 0 : i32
    %c0_i32_0 = arith.constant 0 : i32
    %c0_i32_1 = arith.constant 0 : i32
    return %c0_i32, %c0_i32_0 : i32, i32
  }
  func.func @transform_4(%arg0: i32, %arg1: i32, %arg2: memref<2xi32, #tpu.memory_space<smem>>) -> (i32, i32) {
    %c0_i32 = arith.constant 0 : i32
    %c0_i32_0 = arith.constant 0 : i32
    %c0_i32_1 = arith.constant 0 : i32
    return %c0_i32, %c0_i32_0 : i32, i32
  }
  func.func @transform_5(%arg0: i32, %arg1: i32, %arg2: memref<2xi32, #tpu.memory_space<smem>>) -> (i32, i32, i32) {
    %c0_i32 = arith.constant 0 : i32
    %c0_i32_0 = arith.constant 0 : i32
    return %arg0, %arg1, %c0_i32 : i32, i32, i32
  }
}

</mosaic_0001>

<bundles_post_ra>
// kernel: causal_self_attention_with_cot.1
= control target key start
LH: loop header
LB: loop body
LE: loop exit
PB: predicated region body
PF: predicated region fallthrough
CT: control target
= control target key end

     0   :  { %s1512_s0 = inlined_call_operand.vmem [shape: s32[2], index: 0, kind: input, shape index: {}]   ;;  %s1513_s1 = inlined_call_operand.vmem [shape: bf16[2,10,32], index: 1, kind: input, shape index: {}]   ;;  %s1514_s2 = inlined_call_operand.vmem [shape: bf16[32,96], index: 2, kind: input, shape index: {}]   ;;  %s1515_s3 = inlined_call_operand.vmem [shape: f32[1,96], index: 3, kind: input, shape index: {}]   ;;  %s1516_s4 = inlined_call_operand.vmem [shape: bf16[32,32], index: 4, kind: input, shape index: {}]   ;;  %s1517_s5 = inlined_call_operand.vmem [shape: f32[1,32], index: 5, kind: input, shape index: {}]   ;;  %s1518_s6 = inlined_call_operand.vmem [shape: f32[2,10,32], index: 6, kind: output, shape index: {}]  }
   0x1   :  { %s11_s23 = sshll.u32 %s1512_s0, 4  ;;  %s12_s23 = int_to_ptr.vmem [resolvable:$true] %s11_s23 }
   0x2   :  { %s1281_s24 = scalar_lea.vmem %s12_s23, 16  ;;  %p1286_p1 = scmp.lt.s32.totalorder %s12_s23, %s12_s23 }
   0x3   :  { %p1282_p0 = scmp.ne.s32.totalorder %s12_s23, %s1281_s24  ;;  %p1287_p2 = scmp.lt.s32.totalorder %s1281_s24, %s1281_s24 }
   0x5   :  { %p1288_p3 = por %p1287_p2, %p1286_p1 }
   0x7   :  { %p1289_p4 = pnand %p1288_p3, %p1282_p0 }
   0x9   :  { %1292 = shalt.err (!%p1289_p4)  }
   0xa   :  { %s1319_s25 = smov [#allocation4]  }
   0xb   :  { %14 = dma.vmem_to_smem %s12_s23, 16, %s1319_s25, [#allocation3] }
   0xc   :  { %1305 = dma.done.wait [#allocation3], 16 }
   0xd   :  { %1306 = vsyncadd [#allocation3], 4294967280 }
   0xe   :  { %16 = sfence }
   0xf   :  { %s1372_s26 = smov 0   ;;  %s1374_s27 = smov 0  }
  0x10   :  { %s1376_s28 = smov 0  }
  0x11 LB: > { %s34_s0 = sadd.s32 1, %s1313_s27  ;;  %p1093_p5 = scmp.ge.s32.totalorder %s1317_s28, 1  ;;  %s1317_s28 = sphi %s1376_s28, %s22_s28   ;;  %s1313_s27 = sphi %s1374_s27, %s1520_s27   ;;  %s1309_s26 = sphi %s1372_s26, %s1519_s26  }
  0x12   : > { %p36_p6 = scmp.ge.s32.totalorder %s34_s0, 2  ;;  %p208_p7 = scmp.lt.s32.totalorder %s1317_s28, 3 }
  0x14   : > { %s1522_s0 = smov (%p36_p6, %s34_s0), 0  ;;  %p209_p8 = pnand %p1093_p5, %p208_p7 }
  0x15   : > { %p240_p9 = scmp.lt.s32.totalorder (!%p209_p8), %s1309_s26, 1  ;;  %s1322_s16 = smov (!%p209_p8), 96  }
  0x16   : > { %212 = sbr.rel (%p209_p8) target bundleno = 1544 (0x608), region = 40  ;;  %s1323_s17 = smov (!%p209_p8), 120  }
  0x17   : > { %s1324_s18 = smov (!%p209_p8), 112   ;;  %s1325_s19 = smov (!%p209_p8), 104  }
  0x18   : > { %s394_s20 = sld [smem:[#allocation4 + %s1309_s26]] (!%p209_p8)  ;;  %s1327_s21 = smov (!%p209_p8), 64  }
  0x19   : > { %s1328_s22 = smov (!%p209_p8), 56   ;;  %s1329_s23 = smov (!%p209_p8), 48  }
  0x1a   : > { %s1330_s24 = smov (!%p209_p8), 40   ;;  %s1331_s25 = smov (!%p209_p8), 8  }
  0x1b   : > { %v1244_v0 = vld [vmem:[%s1514_s2 + $0x8] sm:$0xff]   ;;  %v1320_v1 = vmov 0.0   ;;  %v1245_v2 = vld [vmem:[%s1514_s2] sm:$0xff]   ;;  %vm1321_vm0 = vmmov 0   ;;  %s1407_s9 = scalar_select %p240_p9, %s1309_s26, 1  ;;  %vm286_vm1 = vcmask 261120   ;;  %v377_v32 = vlaneseq }
  0x1c   : > { %1141 = vmatprep.subr.bf16.mxu0 %v1320_v1  ;;  %1149 = vmatprep.subr.bf16.mxu1 %v1320_v1  ;;  %v1098_v4 = vld [vmem:[%s1515_s3] ss:$0 sm:$0xff]  ;;  %vm407_vm2 = vcmask 1043456   ;;  %vm403_vm3 = vcmask 64512   ;;  %vm1326_vm8 = vmmov 1   ;;  %vm452_vm14 = vcmask 80896  }
  0x1d   : > { %1142 = vmatpush3.bf16.msra.mxu0 %v1244_v0  ;;  %1145 = vmatprep.mubr.msk.bf16.mxu0 %vm1321_vm0, %v1320_v1  ;;  %s1117_s10 = sshll.u32 %s1407_s9, 3  ;;  %v378_v33 = vshrl.u32 %v377_v32, 7  ;;  %v385_v34 = vand.u32 127, %v377_v32  ;;  %vm456_vm15 = vcmask 74752   ;;  %s1332_s30 = smov 16  }
  0x1e   : > { %1143 = vmatprep.subr.bf16.mxu0 %v1320_v1  ;;  %1151 = vmatprep.mubr.msk.bf16.mxu1 %vm1321_vm0, %v1320_v1  ;;  %s244_s13 = scalar_lea.vmem %s1513_s1, %s1117_s10  ;;  %v395_v35 = vstv %s394_s20  ;;  %s1333_s10 = smov 24  }
  0x1f   : > { %v1246_v3 = vld [vmem:[%s244_s13] sm:$0x1f]   ;;  %vm386_vm4 = vcmp.le.s32.totalorder %v385_v34, %v378_v33  ;;  %vm388_vm5 = vcmp.lt.s32.totalorder %v378_v33, 2  ;;  %vm396_vm7 = vcmp.gt.s32.totalorder %v385_v34, %v395_v35  ;;  %v379_v36 = vadd.s32 8, %v378_v33  ;;  %s1118_s11 = sshll.u32 %s1407_s9, 4 }
  0x20   : > { %vm390_vm6 = vmor %vm386_vm4, %vm388_vm5  ;;  %vm529_vm4 = vcmask 58368  }
  0x21   : > { %1144 = vmatpush3.bf16.msra.mxu0 %v1245_v2  ;;  %vm392_vm9 = vmxor %vm390_vm6, %vm1326_vm8  ;;  %vm387_vm12 = vcmp.le.s32.totalorder %v385_v34, %v379_v36  ;;  %vm798_vm6 = vcmask 189568  }
  0x22   : > { %1161 = vmatprep.subr.bf16.mxu0 %v1320_v1  ;;  %vm397_vm10 = vmand %vm388_vm5, %vm396_vm7  ;;  %vm796_vm5 = vcmask 195712   ;;  %vm931_vm7 = vcmask 261312  }
  0x23   : > { %vm399_vm11 = vmor %vm392_vm9, %vm397_vm10  ;;  %vm1006_vm9 = vcmask 254976  }
  0x24   : > { %1146 = vmatmul.mubr.msk.bf16.vlgmr.msra.gmra.mxu0 %vm286_vm1, %v1246_v3  ;;  %v401_v37 = vsel %vm399_vm11, -1e+30, %v1320_v1  ;;  %vm393_vm13 = vmxor %vm387_vm12, %vm1326_vm8  ;;  %vm933_vm8 = vcmask 255168  }
  0x25   : > { %1163 = vmatprep.mubr.msk.bf16.mxu0 %vm1321_vm0, %v1320_v1  ;;  %v402_v42 = vsel %vm393_vm13, -1e+30, %v1320_v1 }
  0xe4   : > { %v324_v5 = vpop.f32.mrf.mxu0 }
  0xe5   : > { %v325_v6 = vadd.f32 %v1098_v4, %v324_v5 }
  0xe6   : > { %v1147_v7 = vpop.f32.mrf.mxu0 }
  0xe7   : > { %336 = vrot.lane.b32.xlu0 %v325_v6, %s1322_s16  ;;  %v331_v11 = vmul.f32 0.35355338, %v325_v6 }
  0xe8   : > { %v327_v8 = vpop.f32.mrf.mxu0 }
  0xe9   : > { %v328_v9 = vadd.f32 %v1098_v4, %v327_v8 }
  0xea   : > { %v1148_v10 = vpop.f32.mrf.mxu0 }
  0xeb   : > { %v332_v12 = vmul.f32 0.35355338, %v328_v9  ;;  %v1420_v13 = vpack.c.bf16 %v328_v9, %v325_v6  ;;  %338 = vrot.lane.b32.xlu0 %v328_v9, %s1322_s16  ;;  %s253_s16 = scalar_lea.vmem %s1518_s6, %s1118_s11 }
  0xed   : > { %v333_v14 = vpack.c.bf16 %v332_v12, %v331_v11 }
  0xef   : > { %532 = vrot.lane.b32.xlu1 %v333_v14, %s1323_s17 }
  0xf3   : > { %667 = vrot.lane.b32.xlu1 %v333_v14, %s1324_s18 }
  0xf7   : > { %800 = vrot.lane.b32.xlu1 %v333_v14, %s1325_s19 }
 0x159   : > { %v337_v15 = vpop.permute.xlu0 %336 }
 0x15a   : > { %342 = vxpose.xlu0.b32.start [1/2] (short) (narrow) %v337_v15, 32 }
 0x15d   : > { %v339_v16 = vpop.permute.xlu0 %338 }
 0x15e   : > { %343 = vxpose.xlu0.b32.end [2/2] (short) (narrow) %v339_v16, 32 }
 0x161   : > { %v533_v24 = vpop.permute.xlu1 %532 }
 0x165   : > { %v668_v30 = vpop.permute.xlu1 %667 }
 0x169   : > { %v801_v31 = vpop.permute.xlu1 %800 }
 0x1d6   : > { %v358_v17 = vpop.trf.xlu0 }
 0x1da   : > { %v359_v18 = vpop.trf.xlu0 }
 0x1db   : > { %v374_v19 = vpack.c.bf16 %v359_v18, %v358_v17 }
 0x1dd   : > { %v535_v20 = vrot.slane %v374_v19, 4  ;;  %v409_v21 = vsel %vm407_vm2, %v374_v19, 0 }
 0x1de   : > { %1150 = vmatpush3.bf16.msra.mxu1 %v409_v21  ;;  %v360_v22 = vpop.trf.xlu0 }
 0x1df   : > { %v540_v23 = vsel %vm407_vm2, %v535_v20, 0  ;;  %1155 = vmatprep.subr.bf16.mxu1 %v1320_v1 }
 0x1e0   : > { %1162 = vmatpush3.bf16.msra.mxu0 %v540_v23 }
 0x1e1   : > { %1152 = vmatmul.mubr.msk.bf16.vlgmr.msra.gmra.mxu1 %vm403_vm3, %v333_v14  ;;  %1173 = vmatprep.subr.bf16.mxu0 %v1320_v1 }
 0x1e2   : > { %v361_v25 = vpop.trf.xlu0  ;;  %1157 = vmatprep.mubr.msk.bf16.mxu1 %vm1321_vm0, %v1320_v1 }
 0x1e3   : > { %1164 = vmatmul.mubr.msk.bf16.vlgmr.msra.gmra.mxu0 %vm403_vm3, %v533_v24  ;;  %v375_v26 = vpack.c.bf16 %v361_v25, %v360_v22 }
 0x1e4   : > { %1175 = vmatprep.mubr.msk.bf16.mxu0 %vm1321_vm0, %v1320_v1 }
 0x1e5   : > { %v673_v27 = vsel %vm407_vm2, %v375_v26, 0  ;;  %v803_v28 = vrot.slane %v375_v26, 4 }
 0x1e6   : > { %1174 = vmatpush3.bf16.msra.mxu0 %v673_v27 }
 0x1e7   : > { %1185 = vmatprep.subr.bf16.mxu0 %v1320_v1  ;;  %v808_v29 = vsel %vm407_vm2, %v803_v28, 0  ;;  %vm483_vm2 = vcmask 1044480  }
 0x1eb   : > { %1176 = vmatmul.mubr.msk.bf16.vlgmr.msra.gmra.mxu0 %vm403_vm3, %v668_v30 }
 0x1ec   : > { %1186 = vmatpush3.bf16.msra.mxu0 %v808_v29  ;;  %1187 = vmatprep.mubr.msk.bf16.mxu0 %vm1321_vm0, %v1320_v1 }
 0x1ed   : > { %1197 = vmatprep.subr.bf16.mxu0 %v1320_v1 }
 0x1f3   : > { %1188 = vmatmul.mubr.msk.bf16.vlgmr.msra.gmra.mxu0 %vm403_vm3, %v801_v31 }
 0x1f4   : > { %1201 = vmatprep.mubr.msk.bf16.mxu0 %vm1321_vm0, %v1320_v1 }
 0x2a1   : > { %v445_v38 = vpop.f32.mrf.mxu1 }
 0x2a2   : > { %v446_v39 = vadd.f32 %v445_v38, %v401_v37 }
 0x2a3   : > { %v1153_v40 = vpop.f32.mrf.mxu1  ;;  %v576_v41 = vpop.f32.mrf.mxu0 }
 0x2a4   : > { %v577_v43 = vadd.f32 %v576_v41, %v401_v37  ;;  %v453_v44 = vsel %vm452_vm14, %v446_v39, -inf }
 0x2a5   : > { %454 = vmax.xlane.f32.xlu1 %v453_v44  ;;  %v448_v45 = vpop.f32.mrf.mxu1  ;;  %v1165_v46 = vpop.f32.mrf.mxu0 }
 0x2a6   : > { %v449_v47 = vadd.f32 %v448_v45, %v402_v42  ;;  %v583_v52 = vsel %vm452_vm14, %v577_v43, -inf }
 0x2a7   : > { %v1154_v48 = vpop.f32.mrf.mxu1  ;;  %v579_v49 = vpop.f32.mrf.mxu0 }
 0x2a8   : > { %v580_v50 = vadd.f32 %v579_v49, %v402_v42  ;;  %v457_v51 = vsel %vm456_vm15, %v449_v47, -inf }
 0x2a9   : > { %458 = vmax.xlane.f32.xlu0 %v457_v51  ;;  %584 = vmax.xlane.f32.xlu1 %v583_v52  ;;  %v1166_v53 = vpop.f32.mrf.mxu0 }
 0x2aa   : > { %v586_v56 = vsel %vm456_vm15, %v580_v50, -inf }
 0x2ab   : > { %v709_v54 = vpop.f32.mrf.mxu0 }
 0x2ac   : > { %v710_v55 = vadd.f32 %v709_v54, %v401_v37 }
 0x2ad   : > { %587 = vmax.xlane.f32.xlu1 %v586_v56  ;;  %v1177_v57 = vpop.f32.mrf.mxu0 }
 0x2ae   : > { %v716_v60 = vsel %vm452_vm14, %v710_v55, -inf }
 0x2af   : > { %v712_v58 = vpop.f32.mrf.mxu0 }
 0x2b0   : > { %v713_v59 = vadd.f32 %v712_v58, %v402_v42 }
 0x2b1   : > { %717 = vmax.xlane.f32.xlu1 %v716_v60  ;;  %v1178_v61 = vpop.f32.mrf.mxu0 }
 0x2b2   : > { %v719_v0 = vsel %vm456_vm15, %v713_v59, -inf }
 0x2b3   : > { %v844_v62 = vpop.f32.mrf.mxu0 }
 0x2b4   : > { %v845_v63 = vadd.f32 %v844_v62, %v401_v37 }
 0x2b5   : > { %720 = vmax.xlane.f32.xlu1 %v719_v0  ;;  %v1189_v2 = vpop.f32.mrf.mxu0 }
 0x2b6   : > { %v851_v5 = vsel %vm452_vm14, %v845_v63, -inf }
 0x2b7   : > { %v847_v3 = vpop.f32.mrf.mxu0 }
 0x2b8   : > { %v848_v4 = vadd.f32 %v847_v3, %v402_v42 }
 0x2b9   : > { %852 = vmax.xlane.f32.xlu1 %v851_v5  ;;  %v1190_v6 = vpop.f32.mrf.mxu0 }
 0x2ba   : > { %v854_v7 = vsel %vm456_vm15, %v848_v4, -inf }
 0x2bd   : > { %855 = vmax.xlane.f32.xlu1 %v854_v7 }
 0x2bf   : > { %478 = vrot.lane.b32.xlu0 %v1420_v13, %s1327_s21 }
 0x2ce   : > { %606 = vrot.lane.b32.xlu1 %v1420_v13, %s1328_s22 }
 0x32e   : > { %v455_v8 = vpop.xlane.xlu1 %454 }
 0x32f   : > { %v460_v9 = vsub.f32 %v446_v39, %v455_v8 }
 0x331   : > { %v462_v10 = vmul.f32 1.442695, %v460_v9 }
 0x332   : > { %v459_v11 = vpop.xlane.xlu0 %458  ;;  %v585_v12 = vpop.xlane.xlu1 %584 }
 0x333   : > { %1249 = vpow2.f32 %v462_v10  ;;  %v461_v14 = vsub.f32 %v449_v47, %v459_v11  ;;  %v589_v15 = vsub.f32 %v577_v43, %v585_v12 }
 0x335   : > { %v591_v16 = vmul.f32 1.442695, %v589_v15  ;;  %v464_v17 = vmul.f32 1.442695, %v461_v14 }
 0x336   : > { %v479_v18 = vpop.permute.xlu0 %478  ;;  %v588_v19 = vpop.xlane.xlu1 %587 }
 0x337   : > { %v485_v20 = vsel %vm483_vm2, %v479_v18, 0  ;;  %v590_v21 = vsub.f32 %v580_v50, %v588_v19  ;;  %1251 = vpow2.f32 %v591_v16 }
 0x338   : > { %1156 = vmatpush3.bf16.msra.mxu1 %v485_v20  ;;  %1253 = vpow2.f32 %v464_v17 }
 0x339   : > { %1167 = vmatprep.subr.bf16.mxu1 %v1320_v1  ;;  %v593_v22 = vmul.f32 1.442695, %v590_v21 }
 0x33a   : > { %v718_v23 = vpop.xlane.xlu1 %717 }
 0x33b   : > { %v722_v24 = vsub.f32 %v710_v55, %v718_v23  ;;  %1255 = vpow2.f32 %v593_v22 }
 0x33d   : > { %v724_v25 = vmul.f32 1.442695, %v722_v24 }
 0x33e   : > { %v721_v26 = vpop.xlane.xlu1 %720 }
 0x33f   : > { %v723_v27 = vsub.f32 %v713_v59, %v721_v26  ;;  %1257 = vpow2.f32 %v724_v25 }
 0x340   : > { %v1250_v28 = vpop.eup %1249 }
 0x341   : > { %v466_v29 = vsel %vm452_vm14, %v1250_v28, 0.0  ;;  %v726_v30 = vmul.f32 1.442695, %v723_v27 }
 0x342   : > { %v853_v31 = vpop.xlane.xlu1 %852  ;;  %467 = vadd.xlane.f32.xlu1 %v466_v29 }
 0x343   : > { %v857_v32 = vsub.f32 %v845_v63, %v853_v31  ;;  %1259 = vpow2.f32 %v726_v30  ;;  %v1247_v31 = vld [vmem:[%s1516_s4 + $0x8] sm:$0xff]  }
 0x344   : > { %v1252_v33 = vpop.eup %1251  ;;  %1198 = vmatpush3.bf16.msra.mxu0 %v1247_v31 }
 0x345   : > { %v859_v34 = vmul.f32 1.442695, %v857_v32  ;;  %v595_v35 = vsel %vm452_vm14, %v1252_v33, 0.0  ;;  %v1254_v37 = vpop.eup %1253  ;;  %1199 = vmatprep.subr.bf16.mxu0 %v1320_v1 }
 0x346   : > { %v856_v36 = vpop.xlane.xlu1 %855  ;;  %596 = vadd.xlane.f32.xlu1 %v595_v35  ;;  %v469_v40 = vsel %vm456_vm15, %v1254_v37, 0.0 }
 0x347   : > { %1261 = vpow2.f32 %v859_v34  ;;  %v858_v38 = vsub.f32 %v848_v4, %v856_v36 }
 0x348   : > { %v1256_v41 = vpop.eup %1255 }
 0x349   : > { %v861_v39 = vmul.f32 1.442695, %v858_v38  ;;  %v598_v42 = vsel %vm456_vm15, %v1256_v41, 0.0 }
 0x34a   : > { %470 = vadd.xlane.f32.xlu1 %v469_v40  ;;  %v607_v51 = vpop.permute.xlu1 %606 }
 0x34b   : > { %1263 = vpow2.f32 %v861_v39  ;;  %v612_v0 = vsel %vm483_vm2, %v607_v51, 0 }
 0x34c   : > { %v1258_v43 = vpop.eup %1257 }
 0x34d   : > { %v728_v44 = vsel %vm452_vm14, %v1258_v43, 0.0 }
 0x34e   : > { %599 = vadd.xlane.f32.xlu1 %v598_v42 }
 0x350   : > { %v1260_v45 = vpop.eup %1259 }
 0x351   : > { %v731_v48 = vsel %vm456_vm15, %v1260_v45, 0.0 }
 0x352   : > { %729 = vadd.xlane.f32.xlu1 %v728_v44 }
 0x354   : > { %v1462_v46 = vpop.eup %1261 }
 0x355   : > { %v863_v47 = vsel %vm452_vm14, %v1462_v46, 0.0 }
 0x356   : > { %864 = vadd.xlane.f32.xlu0 %v863_v47  ;;  %732 = vadd.xlane.f32.xlu1 %v731_v48  ;;  %v1111_v48 = vld [vmem:[%s1517_s5] ss:$0 sm:$0xff] }
 0x358   : > { %v1264_v49 = vpop.eup %1263 }
 0x359   : > { %v866_v50 = vsel %vm456_vm15, %v1264_v49, 0.0 }
 0x35a   : > { %867 = vadd.xlane.f32.xlu1 %v866_v50 }
 0x36b   : > { %739 = vrot.lane.b32.xlu1 %v1420_v13, %s1329_s23 }
 0x36c   : > { %874 = vrot.lane.b32.xlu0 %v1420_v13, %s1330_s24 }
 0x3cb   : > { %v468_v52 = vpop.xlane.xlu1 %467 }
 0x3cc   : > { %1265 = vrcp.f32 %v468_v52 }
 0x3cf   : > { %v597_v53 = vpop.xlane.xlu1 %596 }
 0x3d3   : > { %v471_v54 = vpop.xlane.xlu1 %470 }
 0x3d4   : > { %1267 = vrcp.f32 %v471_v54 }
 0x3d7   : > { %v600_v55 = vpop.xlane.xlu1 %599 }
 0x3d8   : > { %1269 = vrcp.f32 %v600_v55 }
 0x3d9   : > { %1271 = vrcp.f32 %v597_v53  ;;  %v1266_v57 = vpop.eup %1265 }
 0x3da   : > { %v474_v60 = vmul.f32 %v1266_v57, %v1250_v28 }
 0x3db   : > { %v730_v56 = vpop.xlane.xlu1 %729 }
 0x3df   : > { %v733_v58 = vpop.xlane.xlu1 %732  ;;  %v865_v3 = vpop.xlane.xlu0 %864 }
 0x3e0   : > { %1273 = vrcp.f32 %v733_v58 }
 0x3e1   : > { %v1268_v59 = vpop.eup %1267  ;;  %1275 = vrcp.f32 %v730_v56 }
 0x3e2   : > { %v475_v61 = vmul.f32 %v1268_v59, %v1254_v37 }
 0x3e3   : > { %v868_v13 = vpop.xlane.xlu1 %867  ;;  %v875_v14 = vpop.permute.xlu0 %874 }
 0x3e4   : > { %v476_v62 = vpack.c.bf16 %v475_v61, %v474_v60  ;;  %1277 = vrcp.f32 %v868_v13  ;;  %v880_v17 = vsel %vm483_vm2, %v875_v14, 0 }
 0x3e5   : > { %v1270_v63 = vpop.eup %1269  ;;  %1279 = vrcp.f32 %v865_v3 }
 0x3e6   : > { %1158 = vmatmul.mubr.msk.bf16.vlgmr.msra.gmra.mxu1 %vm452_vm14, %v476_v62  ;;  %v1272_v2 = vpop.eup %1271  ;;  %v604_v4 = vmul.f32 %v1270_v63, %v1256_v41 }
 0x3e7   : > { %1168 = vmatpush3.bf16.msra.mxu1 %v612_v0  ;;  %1169 = vmatprep.mubr.msk.bf16.mxu1 %vm1321_vm0, %v1320_v1  ;;  %v603_v5 = vmul.f32 %v1272_v2, %v1252_v33  ;;  %v740_v6 = vpop.permute.xlu1 %739  ;;  %v1248_v33 = vld [vmem:[%s1516_s4] sm:$0xff]  }
 0x3e8   : > { %1179 = vmatprep.subr.bf16.mxu1 %v1320_v1  ;;  %v745_v9 = vsel %vm483_vm2, %v740_v6, 0  ;;  %1200 = vmatpush3.bf16.msra.mxu0 %v1248_v33 }
 0x3e9   : > { %v605_v7 = vpack.c.bf16 %v604_v4, %v603_v5 }
 0x3ed   : > { %v1274_v8 = vpop.eup %1273 }
 0x3ee   : > { %1170 = vmatmul.mubr.msk.bf16.vlgmr.msra.gmra.mxu1 %vm452_vm14, %v605_v7  ;;  %v1276_v10 = vpop.eup %1275  ;;  %v737_v11 = vmul.f32 %v1274_v8, %v1260_v45 }
 0x3ef   : > { %1180 = vmatpush3.bf16.msra.mxu1 %v745_v9  ;;  %1181 = vmatprep.mubr.msk.bf16.mxu1 %vm1321_vm0, %v1320_v1  ;;  %v736_v12 = vmul.f32 %v1276_v10, %v1258_v43 }
 0x3f0   : > { %1191 = vmatprep.subr.bf16.mxu1 %v1320_v1 }
 0x3f1   : > { %v738_v15 = vpack.c.bf16 %v737_v11, %v736_v12  ;;  %v1278_v16 = vpop.eup %1277 }
 0x3f2   : > { %v1280_v18 = vpop.eup %1279  ;;  %v872_v19 = vmul.f32 %v1278_v16, %v1264_v49 }
 0x3f3   : > { %v871_v20 = vmul.f32 %v1280_v18, %v1462_v46 }
 0x3f5   : > { %v873_v21 = vpack.c.bf16 %v872_v19, %v871_v20 }
 0x3f6   : > { %1182 = vmatmul.mubr.msk.bf16.vlgmr.msra.gmra.mxu1 %vm452_vm14, %v738_v15 }
 0x3f7   : > { %1192 = vmatpush3.bf16.msra.mxu1 %v880_v17  ;;  %1193 = vmatprep.mubr.msk.bf16.mxu1 %vm1321_vm0, %v1320_v1  ;;  %vm663_vm0 = vcmask 130112  }
 0x3fe   : > { %1194 = vmatmul.mubr.msk.bf16.vlgmr.msra.gmra.mxu1 %vm452_vm14, %v873_v21 }
 0x4a6   : > { %v521_v22 = vpop.f32.mrf.mxu1 }
 0x4a7   : > { %528 = vst.msk [vmem:[#allocation2] sm:$0xff] %vm403_vm3, %v521_v22  ;;  %vm665_vm3 = vcmask 123968  }
 0x4a8   : > { %v1159_v23 = vpop.f32.mrf.mxu1 }
 0x4aa   : > { %v524_v24 = vpop.f32.mrf.mxu1 }
 0x4ab   : > { %530 = vst.msk [vmem:[#allocation2 + $0x8] sm:$0x3] %vm529_vm4, %v524_v24 }
 0x4ac   : > { %v1160_v25 = vpop.f32.mrf.mxu1 }
 0x4ae   : > { %v648_v26 = vpop.f32.mrf.mxu1 }
 0x4af   : > { %657 = vrot.lane.b32.xlu1 %v648_v26, %s1331_s25 }
 0x4b0   : > { %v1171_v27 = vpop.f32.mrf.mxu1 }
 0x4b2   : > { %v651_v28 = vpop.f32.mrf.mxu1 }
 0x4b3   : > { %659 = vrot.lane.b32.xlu0 %v651_v28, %s1331_s25 }
 0x4b4   : > { %v1172_v29 = vpop.f32.mrf.mxu1 }
 0x4b6   : > { %v781_v30 = vpop.f32.mrf.mxu1 }
 0x4b7   : > { %790 = vrot.lane.b32.xlu1 %v781_v30, %s1332_s30 }
 0x4b8   : > { %v1183_v32 = vpop.f32.mrf.mxu1 }
 0x4ba   : > { %v784_v34 = vpop.f32.mrf.mxu1 }
 0x4bb   : > { %792 = vrot.lane.b32.xlu0 %v784_v34, %s1332_s30 }
 0x4bc   : > { %v1184_v35 = vpop.f32.mrf.mxu1 }
 0x4be   : > { %v916_v36 = vpop.f32.mrf.mxu1 }
 0x4bf   : > { %925 = vrot.lane.b32.xlu1 %v916_v36, %s1333_s10 }
 0x4c0   : > { %v1195_v37 = vpop.f32.mrf.mxu1 }
 0x4c2   : > { %v919_v38 = vpop.f32.mrf.mxu1 }
 0x4c3   : > { %927 = vrot.lane.b32.xlu0 %v919_v38, %s1333_s10 }
 0x4c4   : > { %v1196_v39 = vpop.f32.mrf.mxu1 }
 0x521   : > { %v658_v40 = vpop.permute.xlu1 %657 }
 0x522   : > { %664 = vst.msk [vmem:[#allocation2] sm:$0xff] %vm663_vm0, %v658_v40 }
 0x525   : > { %v660_v41 = vpop.permute.xlu0 %659 }
 0x526   : > { %666 = vst.msk [vmem:[#allocation2 + $0x8] sm:$0x3] %vm665_vm3, %v660_v41 }
 0x529   : > { %v791_v1 = vpop.permute.xlu1 %790 }
 0x52a   : > { %797 = vst.msk [vmem:[#allocation2] sm:$0xff] %vm796_vm5, %v791_v1 }
 0x52d   : > { %v793_v42 = vpop.permute.xlu0 %792 }
 0x52e   : > { %799 = vst.msk [vmem:[#allocation2 + $0x8] sm:$0x3] %vm798_vm6, %v793_v42 }
 0x531   : > { %v926_v43 = vpop.permute.xlu1 %925 }
 0x532   : > { %932 = vst.msk [vmem:[#allocation2] sm:$0xff] %vm931_vm7, %v926_v43 }
 0x535   : > { %v928_v44 = vpop.permute.xlu0 %927 }
 0x536   : > { %934 = vst.msk [vmem:[#allocation2 + $0x8] sm:$0x3] %vm933_vm8, %v928_v44 }
 0x539   : > { %v935_v45 = vld [vmem:[#allocation2] sm:$0xff] }
 0x53d   : > { %v936_v46 = vld [vmem:[#allocation2 + $0x8] sm:$0x3] }
 0x53e   : > { %v937_v47 = vpack.c.bf16 %v936_v46, %v935_v45 }
 0x540   : > { %1202 = vmatmul.mubr.msk.bf16.vlgmr.msra.gmra.mxu0 %vm286_vm1, %v937_v47 }
 0x600   : > { %v998_v49 = vpop.f32.mrf.mxu0 }
 0x601   : > { %v999_v50 = vadd.f32 %v1111_v48, %v998_v49 }
 0x602   : > { %v1203_v51 = vpop.f32.mrf.mxu0 }
 0x603   : > { %1005 = vst.msk [vmem:[%s253_s16] sm:$0xff] %vm286_vm1, %v999_v50 }
 0x604   : > { %v1001_v52 = vpop.f32.mrf.mxu0 }
 0x605   : > { %v1002_v53 = vadd.f32 %v1111_v48, %v1001_v52 }
 0x606   : > { %v1204_v54 = vpop.f32.mrf.mxu0 }
 0x607   : > { %1007 = vst.msk [vmem:[%s253_s16 + $0x8] sm:$0x3] %vm1006_vm9, %v1002_v53 }
 0x608 PF: > { %s22_s28 = sadd.s32 1, %s1317_s28   ;;  %s1519_s26 = smov %s1313_s27 }
 0x609   : > { %p19_p10 = scmp.ge.s32.totalorder %s22_s28, 4   ;;  %s1520_s27 = smov %s1522_s0 }
 0x60b   :  { %21 = sbr.rel (!%p19_p10) target bundleno = 17 (0x11), region = 70 }

</bundles_post_ra>
